<compile_context>
chip_gen: v7x
topology: tpu7x:2x2x1
jax: 0.10.0
libtpu: 0.0.40
codegen_flags: <defaults>
</compile_context>

<pallas_src>
import functools
import math

import jax
import jax.numpy as jnp
from jax.experimental import pallas as pl
from jax.experimental.pallas import tpu as pltpu


def _ceil_to(a: int, m: int) -> int:
    return ((a + m - 1) // m) * m


def _pick_hw_tile(C: int, HW: int, itemsize: int, target_bytes: int = 1 << 20):
    """Lane tile T (multiple of 128) with C*T*itemsize <= ~target, and padded HW."""
    max_t = max(128, ((target_bytes // max(1, C * itemsize)) // 128) * 128)
    hw_ceil = _ceil_to(HW, 128)
    T = int(min(max_t, hw_ceil))
    HW_pad = _ceil_to(HW, T)
    return T, HW_pad


# --------------------------------------------------------------------------- #
# Fused single-pass kernel: pool + excite + scale on one resident block.      #
# --------------------------------------------------------------------------- #
def _fused_se_kernel(x_ref, w1t_ref, b1_ref, w2_ref, b2_ref, o_ref, *, inv_hw: float):
    # x_ref block: (1, C, HW) — the whole per-sample slab.
    x32 = x_ref[0].astype(jnp.float32)                                        # (C, HW)
    pooled = jnp.sum(x32, axis=-1, keepdims=True) * inv_hw                    # (C, 1)
    # conv1 (1x1, C -> C_r) + ReLU ; w1t_ref is conv1 weight transposed (C, C_r)
    h = jnp.sum(w1t_ref[...] * pooled, axis=0, keepdims=True) + b1_ref[...]   # (1, C_r)
    h = jnp.maximum(h, 0.0)
    # conv2 (1x1, C_r -> C)
    z = jnp.sum(w2_ref[...] * h, axis=1, keepdims=True) + b2_ref[...]         # (C, 1)
    # Hardsigmoid: clip((z + 3) / 6, 0, 1)
    gate = jnp.clip((z + 3.0) * (1.0 / 6.0), 0.0, 1.0)                        # (C, 1)
    o_ref[...] = x_ref[...] * gate[None].astype(o_ref.dtype)                  # (1, C, HW)


# --------------------------------------------------------------------------- #
# Tiled two-pass fallback (very large spatial extents).                       #
# --------------------------------------------------------------------------- #
def _pool_excite_kernel(x_ref, w1t_ref, b1_ref, w2_ref, b2_ref, gate_ref, acc_ref,
                        *, inv_hw: float):
    """Accumulate spatial sum; on the last HW tile run the SE excitation MLP."""
    t = pl.program_id(1)

    @pl.when(t == 0)
    def _():
        acc_ref[...] = jnp.zeros_like(acc_ref)

    # x_ref block: (1, C, T) -> per-channel partial sum over the lane (HW) axis.
    acc_ref[...] += jnp.sum(x_ref[0].astype(jnp.float32), axis=-1, keepdims=True)

    @pl.when(t == pl.num_programs(1) - 1)
    def _():
        pooled = acc_ref[...] * inv_hw                                         # (C, 1)
        h = jnp.sum(w1t_ref[...] * pooled, axis=0, keepdims=True) + b1_ref[...]  # (1, C_r)
        h = jnp.maximum(h, 0.0)
        z = jnp.sum(w2_ref[...] * h, axis=1, keepdims=True) + b2_ref[...]        # (C, 1)
        gate = jnp.clip((z + 3.0) * (1.0 / 6.0), 0.0, 1.0)
        gate_ref[...] = gate[None].astype(gate_ref.dtype)                      # (1, C, 1)


def _scale_kernel(x_ref, gate_ref, o_ref):
    # x_ref: (1, C, T), gate_ref: (1, C, 1) -> broadcast multiply over HW lanes.
    o_ref[...] = x_ref[...] * gate_ref[...].astype(x_ref.dtype)


# --------------------------------------------------------------------------- #
# Wrapper                                                                     #
# --------------------------------------------------------------------------- #
def es_se_forward(x: jax.Array, w1: jax.Array, b1: jax.Array,
                  w2: jax.Array, b2: jax.Array,
                  *, fused_budget_bytes: int = 6 << 20) -> jax.Array:
    """ES_SEModule forward.  x: (N, C, H, W); w1: (C_r, C); w2: (C, C_r)."""
    N, C, H, W = x.shape
    C_r = w1.shape[0]
    HW = H * W
    dtype = x.dtype
    itemsize = jnp.dtype(dtype).itemsize

    xf = x.reshape(N, C, HW)                           # free (contiguous reshape)

    # Weights in f32, laid out so the in-kernel MLP needs no transposes.
    w1t = jnp.asarray(w1, jnp.float32).T               # (C, C_r)
    b1r = jnp.asarray(b1, jnp.float32).reshape(1, C_r)
    w2m = jnp.asarray(w2, jnp.float32)                 # (C, C_r)
    b2c = jnp.asarray(b2, jnp.float32).reshape(C, 1)

    block_bytes = C * HW * itemsize

    if block_bytes <= fused_budget_bytes:
        # ---- Fused single-pass path: x read from HBM exactly once. ----
        out = pl.pallas_call(
            functools.partial(_fused_se_kernel, inv_hw=1.0 / float(HW)),
            out_shape=jax.ShapeDtypeStruct((N, C, HW), dtype),
            grid=(N,),
            in_specs=[
                pl.BlockSpec((1, C, HW), lambda n: (n, 0, 0)),
                pl.BlockSpec((C, C_r), lambda n: (0, 0)),
                pl.BlockSpec((1, C_r), lambda n: (0, 0)),
                pl.BlockSpec((C, C_r), lambda n: (0, 0)),
                pl.BlockSpec((C, 1), lambda n: (0, 0)),
            ],
            out_specs=pl.BlockSpec((1, C, HW), lambda n: (n, 0, 0)),
            compiler_params=pltpu.CompilerParams(
                dimension_semantics=("parallel",),
                vmem_limit_bytes=32 << 20),
        )(xf, w1t, b1r, w2m, b2c)
        return out.reshape(N, C, H, W)

    # ---- Tiled two-pass fallback (pool-reduce + scale). ----
    T, HW_pad = _pick_hw_tile(C, HW, itemsize)
    num_t = HW_pad // T
    if HW_pad != HW:
        xf = jnp.pad(xf, ((0, 0), (0, 0), (0, HW_pad - HW)))

    # Kernel A: global average pool (tiled reduction over HW) + excitation MLP.
    gate = pl.pallas_call(
        functools.partial(_pool_excite_kernel, inv_hw=1.0 / float(HW)),
        out_shape=jax.ShapeDtypeStruct((N, C, 1), jnp.float32),
        grid=(N, num_t),
        in_specs=[
            pl.BlockSpec((1, C, T), lambda n, t: (n, 0, t)),
            pl.BlockSpec((C, C_r), lambda n, t: (0, 0)),
            pl.BlockSpec((1, C_r), lambda n, t: (0, 0)),
            pl.BlockSpec((C, C_r), lambda n, t: (0, 0)),
            pl.BlockSpec((C, 1), lambda n, t: (0, 0)),
        ],
        out_specs=pl.BlockSpec((1, C, 1), lambda n, t: (n, 0, 0)),
        scratch_shapes=[pltpu.VMEM((C, 1), jnp.float32)],
        compiler_params=pltpu.CompilerParams(
            dimension_semantics=("parallel", "arbitrary")),
    )(xf, w1t, b1r, w2m, b2c)

    # Kernel B: out = x * gate (channel-wise, broadcast over HW), fully parallel.
    out_pad = pl.pallas_call(
        _scale_kernel,
        out_shape=jax.ShapeDtypeStruct((N, C, HW_pad), dtype),
        grid=(N, num_t),
        in_specs=[
            pl.BlockSpec((1, C, T), lambda n, t: (n, 0, t)),
            pl.BlockSpec((1, C, 1), lambda n, t: (n, 0, 0)),
        ],
        out_specs=pl.BlockSpec((1, C, T), lambda n, t: (n, 0, t)),
        compiler_params=pltpu.CompilerParams(
            dimension_semantics=("parallel", "parallel")),
    )(xf, gate)

    if HW_pad != HW:
        out_pad = out_pad[:, :, :HW]
    return out_pad.reshape(N, C, H, W)


class ES_SEModule:
    """JAX/Pallas port of the PyTorch ES_SEModule (squeeze-excitation block)."""

    def __init__(self, channel: int, reduction: int = 4, key=None):
        if key is None:
            key = jax.random.PRNGKey(0)
        c_r = channel // reduction
        k1, k2, k3, k4 = jax.random.split(key, 4)
        s1 = 1.0 / math.sqrt(channel)   # conv1 fan-in = channel (1x1 kernel)
        s2 = 1.0 / math.sqrt(c_r)       # conv2 fan-in = channel // reduction
        # PyTorch Conv2d(k=1) weights squeezed to (out, in); biases (out,).
        self.w1 = jax.random.uniform(k1, (c_r, channel), jnp.float32, -s1, s1)
        self.b1 = jax.random.uniform(k2, (c_r,), jnp.float32, -s1, s1)
        self.w2 = jax.random.uniform(k3, (channel, c_r), jnp.float32, -s2, s2)
        self.b2 = jax.random.uniform(k4, (channel,), jnp.float32, -s2, s2)

    def __call__(self, x: jax.Array) -> jax.Array:
        return es_se_forward(x, self.w1, self.b1, self.w2, self.b2)


if __name__ == "__main__":
    key = jax.random.PRNGKey(0)
    kx, kparams = jax.random.split(key)

    # Small NCHW input consistent with the module (channel divisible by reduction).
    N, C, H, W = 2, 16, 16, 16
    reduction = 4
    x = jax.random.normal(kx, (N, C, H, W), dtype=jnp.float32)

    module = ES_SEModule(C, reduction=reduction, key=kparams)

    # Pure-JAX reference of the PyTorch forward.
    pooled = jnp.mean(x, axis=(2, 3))                               # (N, C)
    h = jnp.maximum(pooled @ module.w1.T + module.b1, 0.0)          # (N, C_r)
    z = h @ module.w2.T + module.b2                                 # (N, C)
    g = jnp.clip((z + 3.0) / 6.0, 0.0, 1.0)                         # hardsigmoid
    ref = x * g[:, :, None, None]

    # Fused single-pass path (default).
    out = jax.block_until_ready(module(x))
    assert out.shape == ref.shape
    assert jnp.allclose(out, ref, atol=1e-5, rtol=1e-5), float(jnp.max(jnp.abs(out - ref)))

    # Tiled two-pass fallback, forced, to exercise the reduction + scale kernels too.
    out2 = jax.block_until_ready(
        es_se_forward(x, module.w1, module.b1, module.w2, module.b2,
                      fused_budget_bytes=0))
    assert jnp.allclose(out2, ref, atol=1e-5, rtol=1e-5), float(jnp.max(jnp.abs(out2 - ref)))

    print("KERNEL_OK")
</pallas_src>

<mosaic_0001>
module attributes {stable_mosaic.version = 11 : i64} {
  func.func @_fused_se_kernel(%arg0: i32, %arg1: memref<1x16x256xf32, #tpu.memory_space<vmem>>, %arg2: memref<16x4xf32, #tpu.memory_space<vmem>>, %arg3: memref<1x4xf32, #tpu.memory_space<vmem>>, %arg4: memref<16x4xf32, #tpu.memory_space<vmem>>, %arg5: memref<16x1xf32, #tpu.memory_space<vmem>>, %arg6: memref<1x16x256xf32, #tpu.memory_space<vmem>>) attributes {dimension_semantics = [#tpu.dimension_semantics<parallel>], iteration_bounds = array<i64: 2>, scalar_prefetch = 0 : i64, scratch_operands = 0 : i64, tpu.core_type = #tpu.core_type<tc>, window_params = [{transform_indices = @transform_0, window_bounds = array<i64: 1, 16, 256>}, {pipeline_mode = #tpu.pipeline_mode<synchronous>, transform_indices = @transform_1, window_bounds = array<i64: 16, 4>}, {pipeline_mode = #tpu.pipeline_mode<synchronous>, transform_indices = @transform_2, window_bounds = array<i64: 1, 4>}, {pipeline_mode = #tpu.pipeline_mode<synchronous>, transform_indices = @transform_3, window_bounds = array<i64: 16, 4>}, {pipeline_mode = #tpu.pipeline_mode<synchronous>, transform_indices = @transform_4, window_bounds = array<i64: 16, 1>}, {transform_indices = @transform_5, window_bounds = array<i64: 1, 16, 256>}]} {
    %c0 = arith.constant 0 : index
    %c0_0 = arith.constant 0 : index
    %c0_1 = arith.constant 0 : index
    %0 = vector.load %arg1[%c0, %c0_0, %c0_1] : memref<1x16x256xf32, #tpu.memory_space<vmem>>, vector<1x16x256xf32>
    %1 = vector.shape_cast %0 : vector<1x16x256xf32> to vector<16x256xf32>
    %cst = arith.constant dense<0.000000e+00> : vector<16xf32>
    %2 = vector.multi_reduction <add>, %1, %cst [1] : vector<16x256xf32> to vector<16xf32>
    %3 = vector.shape_cast %2 : vector<16xf32> to vector<16x1xf32>
    %cst_2 = arith.constant 3.906250e-03 : f32
    %4 = vector.broadcast %cst_2 : f32 to vector<16x1xf32>
    %5 = arith.mulf %3, %4 : vector<16x1xf32>
    %c0_3 = arith.constant 0 : index
    %c0_4 = arith.constant 0 : index
    %6 = vector.load %arg2[%c0_3, %c0_4] : memref<16x4xf32, #tpu.memory_space<vmem>>, vector<16x4xf32>
    %7 = vector.broadcast %5 : vector<16x1xf32> to vector<16x4xf32>
    %8 = arith.mulf %6, %7 : vector<16x4xf32>
    %cst_5 = arith.constant dense<0.000000e+00> : vector<4xf32>
    %9 = vector.multi_reduction <add>, %8, %cst_5 [0] : vector<16x4xf32> to vector<4xf32>
    %10 = vector.shape_cast %9 : vector<4xf32> to vector<1x4xf32>
    %c0_6 = arith.constant 0 : index
    %c0_7 = arith.constant 0 : index
    %11 = vector.load %arg3[%c0_6, %c0_7] : memref<1x4xf32, #tpu.memory_space<vmem>>, vector<1x4xf32>
    %12 = arith.addf %10, %11 : vector<1x4xf32>
    %cst_8 = arith.constant 0.000000e+00 : f32
    %13 = vector.broadcast %cst_8 : f32 to vector<1x4xf32>
    %14 = arith.maximumf %12, %13 : vector<1x4xf32>
    %c0_9 = arith.constant 0 : index
    %c0_10 = arith.constant 0 : index
    %15 = vector.load %arg4[%c0_9, %c0_10] : memref<16x4xf32, #tpu.memory_space<vmem>>, vector<16x4xf32>
    %16 = vector.broadcast %14 : vector<1x4xf32> to vector<16x4xf32>
    %17 = arith.mulf %15, %16 : vector<16x4xf32>
    %cst_11 = arith.constant dense<0.000000e+00> : vector<16xf32>
    %18 = vector.multi_reduction <add>, %17, %cst_11 [1] : vector<16x4xf32> to vector<16xf32>
    %19 = vector.shape_cast %18 : vector<16xf32> to vector<16x1xf32>
    %c0_12 = arith.constant 0 : index
    %c0_13 = arith.constant 0 : index
    %20 = vector.load %arg5[%c0_12, %c0_13] : memref<16x1xf32, #tpu.memory_space<vmem>>, vector<16x1xf32>
    %21 = arith.addf %19, %20 : vector<16x1xf32>
    %cst_14 = arith.constant 3.000000e+00 : f32
    %22 = vector.broadcast %cst_14 : f32 to vector<16x1xf32>
    %23 = arith.addf %21, %22 : vector<16x1xf32>
    %cst_15 = arith.constant 0.166666672 : f32
    %24 = vector.broadcast %cst_15 : f32 to vector<16x1xf32>
    %25 = arith.mulf %23, %24 : vector<16x1xf32>
    %cst_16 = arith.constant 0.000000e+00 : f32
    %cst_17 = arith.constant 1.000000e+00 : f32
    %26 = vector.broadcast %cst_16 : f32 to vector<16x1xf32>
    %27 = arith.maximumf %26, %25 : vector<16x1xf32>
    %28 = vector.broadcast %cst_17 : f32 to vector<16x1xf32>
    %29 = arith.minimumf %28, %27 : vector<16x1xf32>
    %c0_18 = arith.constant 0 : index
    %c0_19 = arith.constant 0 : index
    %c0_20 = arith.constant 0 : index
    %30 = vector.load %arg1[%c0_18, %c0_19, %c0_20] : memref<1x16x256xf32, #tpu.memory_space<vmem>>, vector<1x16x256xf32>
    %31 = vector.shape_cast %29 : vector<16x1xf32> to vector<1x16x1xf32>
    %32 = vector.broadcast %31 : vector<1x16x1xf32> to vector<1x16x256xf32>
    %33 = arith.mulf %30, %32 : vector<1x16x256xf32>
    %c0_21 = arith.constant 0 : index
    %c0_22 = arith.constant 0 : index
    %c0_23 = arith.constant 0 : index
    %34 = vector.load %arg6[%c0_21, %c0_22, %c0_23] : memref<1x16x256xf32, #tpu.memory_space<vmem>>, vector<1x16x256xf32>
    tpu.vector_store %arg6[%c0_21, %c0_22, %c0_23], %33 {strides = array<i32>} : memref<1x16x256xf32, #tpu.memory_space<vmem>>, vector<1x16x256xf32>,
    return
  }
  func.func @transform_0(%arg0: i32) -> (i32, i32, i32) {
    %c0_i32 = arith.constant 0 : i32
    %c0_i32_0 = arith.constant 0 : i32
    %c0_i32_1 = arith.constant 0 : i32
    return %arg0, %c0_i32, %c0_i32_0 : i32, i32, i32
  }
  func.func @transform_1(%arg0: i32) -> (i32, i32) {
    %c0_i32 = arith.constant 0 : i32
    %c0_i32_0 = arith.constant 0 : i32
    %c0_i32_1 = arith.constant 0 : i32
    return %c0_i32, %c0_i32_0 : i32, i32
  }
  func.func @transform_2(%arg0: i32) -> (i32, i32) {
    %c0_i32 = arith.constant 0 : i32
    %c0_i32_0 = arith.constant 0 : i32
    %c0_i32_1 = arith.constant 0 : i32
    return %c0_i32, %c0_i32_0 : i32, i32
  }
  func.func @transform_3(%arg0: i32) -> (i32, i32) {
    %c0_i32 = arith.constant 0 : i32
    %c0_i32_0 = arith.constant 0 : i32
    %c0_i32_1 = arith.constant 0 : i32
    return %c0_i32, %c0_i32_0 : i32, i32
  }
  func.func @transform_4(%arg0: i32) -> (i32, i32) {
    %c0_i32 = arith.constant 0 : i32
    %c0_i32_0 = arith.constant 0 : i32
    %c0_i32_1 = arith.constant 0 : i32
    return %c0_i32, %c0_i32_0 : i32, i32
  }
  func.func @transform_5(%arg0: i32) -> (i32, i32, i32) {
    %c0_i32 = arith.constant 0 : i32
    %c0_i32_0 = arith.constant 0 : i32
    %c0_i32_1 = arith.constant 0 : i32
    return %arg0, %c0_i32, %c0_i32_0 : i32, i32, i32
  }
}

</mosaic_0001>

<bundles_post_ra>
// kernel: tpu_custom_call.1
= control target key start
LH: loop header
LB: loop body
LE: loop exit
PB: predicated region body
PF: predicated region fallthrough
CT: control target
= control target key end

     0   :  { %10 = vsyncpa [#allocation3], 0  ;;  %s814_s0 = inlined_call_operand.hbm [shape: f32[2,16,256], index: 0, kind: input, shape index: {}]   ;;  %s815_s1 = inlined_call_operand.vmem [shape: f32[16,4], index: 1, kind: input, shape index: {}]   ;;  %s816_s2 = inlined_call_operand.vmem [shape: f32[1,4], index: 2, kind: input, shape index: {}]   ;;  %s817_s3 = inlined_call_operand.vmem [shape: f32[16,4], index: 3, kind: input, shape index: {}]   ;;  %s818_s4 = inlined_call_operand.vmem [shape: f32[16,1], index: 4, kind: input, shape index: {}]   ;;  %s819_s5 = inlined_call_operand.hbm [shape: f32[2,16,256], index: 5, kind: output, shape index: {}]  }
   0x1   :  { %12 = vsyncpa [#allocation3 + $0x1], 0 }
   0x2   :  { %13 = vsyncpa [#allocation4], 0 }
   0x3   :  { %15 = vsyncpa [#allocation4 + $0x1], 0  ;;  %s607_s18 = smov 0   ;;  %s609_s19 = smov 0  }
   0x4   :  { %s611_s20 = smov 0   ;;  %s613_s21 = smov 0  }
   0x5 LB: > { %s628_s22 = sadd.s32 4294967295, %s568_s21   ;;  %s403_s23 = sadd.s32 4294967294, %s568_s21   ;;  %s568_s21 = sphi %s613_s21, %s832_s21   ;;  %s564_s20 = sphi %s611_s20, %s831_s20   ;;  %s560_s19 = sphi %s609_s19, %s830_s19   ;;  %s556_s18 = sphi %s607_s18, %s829_s18  }
   0x6   : > { %s632_s24 = sadd.s32 1, %s568_s21   ;;  %s28_s25 = sadd.s32 1, %s564_s20 }
   0x7   : > { %s25_s26 = ssub.s32 %s568_s21, %s632_s24  ;;  %p35_p0 = scmp.ne.s32.totalorder %s564_s20, %s560_s19 }
   0x8   : > { %p26_p1 = scmp.eq.s32.totalorder %s25_s26, 0  ;;  %p36_p2 = scmp.eq.s32.totalorder %s568_s21, 0 }
   0x9   : > { %p41_p3 = scmp.ne.s32.totalorder %s560_s19, %s556_s18  ;;  %p42_p4 = scmp.eq.s32.totalorder %s628_s22, 0 }
   0xa   : > { %s644_s27 = scalar_select %p26_p1, %s564_s20, %s28_s25  }
   0xb   : > { %p646_p5 = por %p36_p2, %p35_p0  ;;  %p650_p6 = por %p42_p4, %p41_p3 }
   0xc   : > { %p149_p7 = scmp.eq.s32.totalorder %s628_s22, 1  ;;  %p155_p8 = scmp.eq.s32.totalorder %s403_s23, 1 }
   0xd   : > { %p431_p10 = scmp.lt.s32.totalorder %s568_s21, 2  ;;  %s187_s7 = sand.u32 1, %s564_s20  }
   0xe   : > { %p657_p11 = por %p149_p7, %p35_p0  ;;  %p661_p12 = por %p155_p8, %p41_p3 }
   0xf   : > { %s417_s8 = sshll.u32 %s568_s21, 9  ;;  %s406_s9 = sshll.u32 %s187_s7, 5 }
  0x10   : > { %s823_s30 = scalar_select %p657_p11, 1, 0 }
  0x11   : > { %s824_s6 = scalar_select %p661_p12, 1, 0 }
  0x12   : > { %s670_s12 = scalar_lea.hbm %s814_s0, %s417_s8  ;;  %s191_s13 = scalar_lea.vmem [#allocation2], %s406_s9 }
  0x13   : > { %s198_s14 = sshll.u32 %s191_s13, 4  ;;  %p674_p13 = pnand %p431_p10, %p646_p5  ;;  %s678_s14 = int_to_ptr.vmem [resolvable:$true] %s198_s14 }
  0x14   : > { %s680_s16 = scalar_lea.sflag [#allocation3], %s187_s7  ;;  %s472_s17 = scalar_lea.hbm %s670_s12, 512 }
  0x15   : > { %p473_p0 = scmp.ne.s32.totalorder %s670_s12, %s472_s17  ;;  %p474_p1 = pneg %p674_p13 }
  0x16   : > { %s477_s26 = scalar_lea.hbm %s814_s0, 1024  ;;  %p478_p4 = scmp.lt.u32.totalorder %s670_s12, %s814_s0 }
  0x17   : > { %p475_p2 = pnand %p474_p1, %p473_p0  ;;  %p479_p5 = scmp.lt.u32.totalorder %s477_s26, %s472_s17 }
  0x18   : > { %p481_p8 = scmp.lt.u32.totalorder %s472_s17, %s670_s12 }
  0x19   : > { %p476_p3 = pneg %p475_p2  ;;  %p480_p7 = por %p479_p5, %p478_p4 }
  0x1b   : > { %p482_p10 = por %p481_p8, %p480_p7 }
  0x1d   : > { %p483_p9 = pnand %p482_p10, %p476_p3 }
  0x1f   : > { %486 = shalt.err (!%p483_p9)
}
  0x20   : > { %s487_s7 = scalar_lea.vmem %s678_s14, 512  ;;  %s570_s9 = smov [#allocation2]  }
  0x21   : > { %p488_p0 = scmp.ne.s32.totalorder %s678_s14, %s487_s7  ;;  %s492_s10 = sshll.u32 %s570_s9, 4  ;;  %s493_s10 = int_to_ptr.vmem [resolvable:$false] %s492_s10 }
  0x22   : > { %s494_s11 = scalar_lea.vmem %s493_s10, 1024  ;;  %p495_p11 = scmp.lt.s32.totalorder %s678_s14, %s493_s10 }
  0x23   : > { %p490_p2 = pnand %p488_p0, %p474_p1  ;;  %p496_p4 = scmp.lt.s32.totalorder %s494_s11, %s487_s7 }
  0x25   : > { %p491_p12 = pneg %p490_p2  ;;  %p497_p5 = por %p496_p4, %p495_p11 }
  0x27   : > { %p498_p7 = pnand %p497_p5, %p491_p12 }
  0x29   : > { %501 = shalt.err (!%p498_p7)
}
  0x2a   : > { %s571_s13 = smov 256   ;;  %s572_s17 = smov 16  }
  0x2b   : > { %426 = dma.hbm_to_vmem [thread:$0]  (!%p674_p13), %s670_s12, 512, %s678_s14, %s680_s16, %s571_s13, %s571_s13, %s572_s17  }
  0x2c   : > { %p409_p9 = scmp.ge.s32.totalorder %s568_s21, 1  ;;  %p206_p1 = scmp.lt.s32.totalorder %s568_s21, 3 }
  0x2e   : > { %p207_p3 = pnand %p409_p9, %p206_p1 }
  0x2f   : > { %s711_s23 = sand.u32 (!%p207_p3), 1, %s560_s19  }
  0x30   : > { %210 = sbr.rel (%p207_p3) target bundleno = 534 (0x216), region = 40  ;;  %s410_s25 = sshll.u32 (!%p207_p3), %s711_s23, 5 }
  0x31   : > { %s213_s26 = scalar_lea.sflag (!%p207_p3), [#allocation3], %s711_s23  ;;  %s216_s28 = scalar_lea.vmem (!%p207_p3), [#allocation2], %s410_s25 }
  0x37   : > { %547 = dma.done.wait (%p650_p6), %s213_s26, 512  }
  0x38   : > { %549 = vsyncadd (%p650_p6), %s213_s26, 4294966784  ;;  %v721_v0 = vld [vmem:[%s216_s28] sm:$0xff]  ;;  %v723_v1 = vld [vmem:[%s216_s28 + $0x8] sm:$0xff]  ;;  %vm259_vm0 = vcmask 31744   ;;  %v274_v20 = vlaneseq  ;;  %v573_v36 = vmov 0   ;;  %s242_s29 = scalar_lea.vmem [#allocation5], %s410_s25 }
  0x39   : > { %v725_v2 = vld [vmem:[%s216_s28 + $0x10] sm:$0xff]  ;;  %v247_v3 = vadd.f32 %v723_v1, %v721_v0  ;;  %v729_v4 = vld [vmem:[%s216_s28 + $0x18] sm:$0xff]  ;;  %v255_v8 = vld [vmem:[%s815_s1] sm:$0xff]  ;;  %470 = vset.pattern.permute.xlu0 %v573_v36  ;;  %471 = vset.pattern.permute.xlu1 %v573_v36  ;;  %s330_s12 = sshll.u32 %s242_s29, 4  ;;  %s418_s14 = sshll.u32 %s628_s22, 9  ;;  %s763_s12 = int_to_ptr.vmem [resolvable:$true] %s330_s12 }
  0x3a   : > { %v250_v5 = vadd.f32 %v729_v4, %v725_v2  ;;  %v256_v9 = vld [vmem:[%s815_s1 + $0x8] sm:$0xff]  ;;  %v275_v23 = vshrl.u32 %v274_v20, 7  ;;  %v269_v24 = vld [vmem:[%s816_s2] sm:$0x1]  ;;  %s768_s25 = scalar_lea.hbm %s819_s5, %s418_s14  ;;  %s317_s22 = scalar_lea.sflag [#allocation4], %s711_s23 }
  0x3b   : > { %248 = vadd.xlane.f32.xlu0 %v247_v3  ;;  %v272_v29 = vld [vmem:[%s817_s3] sm:$0xff]  ;;  %v273_v31 = vld [vmem:[%s817_s3 + $0x8] sm:$0xff]  ;;  %s502_s8 = scalar_lea.vmem %s763_s12, 512  ;;  %p826_p11 = scmp.ne.s32.totalorder %s823_s30, 0 }
  0x3c   : > { %v276_v27 = vsub.s32 0, %v275_v23  ;;  %v286_v37 = vld [vmem:[%s818_s4] sm:$0xff]  ;;  %v287_v40 = vld [vmem:[%s818_s4 + $0x8] sm:$0xff]  ;;  %p503_p6 = scmp.ne.s32.totalorder %s763_s12, %s502_s8  ;;  %s574_s7 = smov [#allocation5]  }
  0x3d   : > { %s506_s9 = sshll.u32 %s574_s7, 4  ;;  %s507_s9 = int_to_ptr.vmem [resolvable:$false] %s506_s9 }
  0x3e   : > { %p504_p12 = pnand %p503_p6, %p826_p11  ;;  %s508_s10 = scalar_lea.vmem %s507_s9, 1024 }
  0x3f   : > { %251 = vadd.xlane.f32.xlu0 %v250_v5  ;;  %p509_p8 = scmp.lt.s32.totalorder %s763_s12, %s507_s9  ;;  %p510_p10 = scmp.lt.s32.totalorder %s508_s10, %s502_s8 }
  0x40   : > { %p505_p13 = pneg %p504_p12 }
  0x41   : > { %p511_p0 = por %p510_p10, %p509_p8 }
  0x43   : > { %p512_p2 = pnand %p511_p0, %p505_p13 }
  0xc8   : > { %v249_v6 = vpop.xlane.xlu0 %248 }
  0xc9   : > { %v253_v7 = vmul.f32 0.00390625, %v249_v6 }
  0xcb   : > { %v257_v11 = vmul.f32 %v255_v8, %v253_v7 }
  0xcc   : > { %v252_v10 = vpop.xlane.xlu0 %251 }
  0xcd   : > { %v254_v12 = vmul.f32 0.00390625, %v252_v10  ;;  %v260_v14 = vsel %vm259_vm0, %v257_v11, 0.0 }
  0xcf   : > { %v258_v13 = vmul.f32 %v256_v9, %v254_v12 }
  0xd1   : > { %v261_v15 = vsel %vm259_vm0, %v258_v13, 0.0 }
  0xd2   : > { %v262_v16 = vadd.f32 %v261_v15, %v260_v14 }
  0xd4   : > { %v263_v17 = vrot.slane %v262_v16, 4 }
  0xd6   : > { %v264_v18 = vadd.f32 %v263_v17, %v262_v16 }
  0xd8   : > { %v265_v19 = vrot.slane %v264_v18, 2 }
  0xda   : > { %v266_v21 = vadd.f32 %v265_v19, %v264_v18 }
  0xdc   : > { %v267_v22 = vrot.slane %v266_v21, 1 }
  0xde   : > { %v268_v25 = vadd.f32 %v267_v22, %v266_v21 }
  0xe0   : > { %v270_v26 = vadd.f32 %v269_v24, %v268_v25 }
  0xe2   : > { %v271_v28 = vmax.f32 %v270_v26, 0.0 }
  0xe4   : > { %v277_v30 = vrot.slane %v271_v28, %v276_v27 }
  0xe6   : > { %v278_v32 = vmul.f32 %v277_v30, %v272_v29  ;;  %v279_v34 = vmul.f32 %v277_v30, %v273_v31 }
  0xe8   : > { %v280_v33 = vsel %vm259_vm0, %v278_v32, 0.0  ;;  %v283_v35 = vsel %vm259_vm0, %v279_v34, 0.0 }
  0xe9   : > { %281 = vadd.xlane.f32.xlu1 %v280_v33 }
  0xed   : > { %284 = vadd.xlane.f32.xlu1 %v283_v35 }
 0x176   : > { %v282_v38 = vpop.xlane.xlu1 %281 }
 0x177   : > { %v288_v39 = vadd.f32 %v286_v37, %v282_v38 }
 0x179   : > { %v290_v41 = vadd.f32 3.0, %v288_v39 }
 0x17a   : > { %v285_v42 = vpop.xlane.xlu1 %284 }
 0x17b   : > { %v292_v43 = vmul.f32 0.16666667, %v290_v41  ;;  %v289_v44 = vadd.f32 %v287_v40, %v285_v42 }
 0x17d   : > { %v294_v45 = vmax.f32 %v292_v43, 0.0  ;;  %v291_v46 = vadd.f32 3.0, %v289_v44 }
 0x17f   : > { %v296_v47 = vmin.f32 %v294_v45, 1.0  ;;  %v293_v48 = vmul.f32 0.16666667, %v291_v46 }
 0x181   : > { %v295_v49 = vmax.f32 %v293_v48, 0.0  ;;  %300 = vperm.xlu0 %470, %v296_v47  }
 0x183   : > { %v297_v50 = vmin.f32 %v295_v49, 1.0 }
 0x185   : > { %305 = vperm.xlu1 %471, %v297_v50  }
 0x200   : > { %v301_v51 = vpop.permute.xlu0 %300 }
 0x201   : > { %v308_v52 = vmul.f32 %v301_v51, %v721_v0  ;;  %v309_v53 = vmul.f32 %v301_v51, %v723_v1 }
 0x203   : > { %312 = vst [vmem:[%s242_s29] sm:$0xff] %v308_v52  ;;  %313 = vst [vmem:[%s242_s29 + $0x8] sm:$0xff] %v309_v53 }
 0x204   : > { %v306_v54 = vpop.permute.xlu1 %305 }
 0x205   : > { %v310_v55 = vmul.f32 %v306_v54, %v725_v2  ;;  %v311_v56 = vmul.f32 %v306_v54, %v729_v4 }
 0x207   : > { %314 = vst [vmem:[%s242_s29 + $0x10] sm:$0xff] %v310_v55  ;;  %315 = vst [vmem:[%s242_s29 + $0x18] sm:$0xff] %v311_v56 }
 0x208   : > { %515 = shalt.err (!%p512_p2)
}
 0x209   : > { %s516_s11 = scalar_lea.hbm %s768_s25, 512  ;;  %s520_s26 = scalar_lea.hbm %s819_s5, 1024 }
 0x20a   : > { %p517_p4 = scmp.ne.s32.totalorder %s768_s25, %s516_s11  ;;  %p521_p9 = scmp.lt.u32.totalorder %s768_s25, %s819_s5 }
 0x20b   : > { %p522_p1 = scmp.lt.u32.totalorder %s520_s26, %s516_s11  ;;  %p524_p6 = scmp.lt.u32.totalorder %s516_s11, %s768_s25 }
 0x20c   : > { %p518_p5 = pnand %p517_p4, %p826_p11 }
 0x20d   : > { %p523_p3 = por %p522_p1, %p521_p9 }
 0x20e   : > { %p519_p7 = pneg %p518_p5 }
 0x20f   : > { %p525_p12 = por %p524_p6, %p523_p3 }
 0x211   : > { %p526_p13 = pnand %p525_p12, %p519_p7 }
 0x213   : > { %529 = shalt.err (!%p526_p13)
}
 0x214   : > { %s575_s14 = smov 256   ;;  %s576_s15 = smov 16  }
 0x215   : > { %421 = dma.vmem_to_hbm [thread:$0]  (%p826_p11), %s763_s12, 512, %s768_s25, %s317_s22, %s575_s14, %s575_s14, %s576_s15  }
 0x216 PF: > { %s345_s16 = sand.u32 1, %s556_s18   ;;  %p827_p8 = scmp.ne.s32.totalorder %s824_s6, 0 }
 0x217   : > { %p828_p10 = scmp.ge.s32.totalorder %s568_s21, 2  ;;  %s346_s8 = scalar_lea.sflag [#allocation4], %s345_s16 }
 0x219   : > { %p428_p0 = pnand %p828_p10, %p827_p8 }
 0x21b   : > { %551 = dma.done.wait (!%p428_p0), %s346_s8, 512  }
 0x21c   : > { %553 = vsyncadd (!%p428_p0), %s346_s8, 4294966784  ;;  %p18_p2 = scmp.ge.s32.totalorder %s632_s24, 4   ;;  %s829_s18 = smov %s560_s19 }
 0x21d   : > { %s830_s19 = smov %s564_s20  ;;  %s831_s20 = smov %s644_s27 }
 0x21e   : > { %s832_s21 = smov %s632_s24  ;;  %20 = sbr.rel (!%p18_p2) target bundleno = 5 (0x5), region = 85 }
 0x225   :  { %351 = vsyncpa [#allocation3], 1 }
 0x226   :  { %353 = vsyncpa [#allocation3 + $0x1], 1 }
 0x227   :  { %354 = vsyncpa [#allocation4], 1 }
 0x228   :  { %356 = vsyncpa [#allocation4 + $0x1], 1 }

</bundles_post_ra>
